<compile_context>
chip_gen: v7x
topology: tpu7x:2x2x1
jax: 0.10.0
libtpu: 0.0.40
codegen_flags: <defaults>
</compile_context>

<pallas_src>
import functools

import numpy as np
import jax
import jax.numpy as jnp
from jax import lax
from jax.experimental import pallas as pl
from jax.experimental.pallas import tpu as pltpu

_LANE = 128
_SUB = 8


def _round_up(n, m):
    return max(m, ((n + m - 1) // m) * m)


def _pad_idx(idx, n):
    idx = jnp.asarray(idx, jnp.int32)
    pad = n - idx.shape[0]
    if pad > 0:
        idx = jnp.concatenate([idx, jnp.zeros((pad,), jnp.int32)])
    return idx


def _lane_dense_score(score):
    """Flatten + zero-pad the score map into a (rows, 128) lane-dense slab."""
    size_sum = int(np.prod(score.shape))
    rows = _round_up(pl.cdiv(size_sum, _LANE), _SUB)
    flat = score.reshape(-1)
    pad = rows * _LANE - size_sum
    if pad > 0:
        flat = jnp.pad(flat, (0, pad))
    return flat.reshape(rows, _LANE), size_sum, rows


def prepare_anchors(anchors, anchors_per_loc):
    """Hoistable static transform: (H, W, A*7) -> lane-major (7, H*W*A)."""
    H, W, _ = anchors.shape
    return anchors.reshape(H * W * anchors_per_loc, 7).T


# --------------------------------------------------------------------------
# Kernels
# --------------------------------------------------------------------------
def _masked_log_sum(s, eps, size_sum):
    """sum over valid map elements of log((1+eps) - s); caller negates once."""
    row = lax.broadcasted_iota(jnp.int32, s.shape, 0)
    lane = lax.broadcasted_iota(jnp.int32, s.shape, 1)
    valid = row * s.shape[1] + lane < size_sum
    return jnp.sum(jnp.where(valid, jnp.log((1.0 + eps) - s), 0.0))


def _cls_only_neg_kernel(score_ref, out_ref, *, eps, size_sum):
    # pi is None branch: clsLoss = mean(-log(1 - score + eps))
    s = score_ref[...].astype(jnp.float32)                 # widen-on-load
    out_ref[0] = -_masked_log_sum(s, eps, size_sum) / jnp.float32(size_sum)


def _fused_loss_kernel(meta_ref, score_ref, sel_ref, pos_ref,
                       cls_out_ref, reg_out_ref, t_ref, *,
                       a, b, eps, size_sum, pos_pad):
    # meta_ref lives in SMEM (scalar prefetch): [n_pos, n_neg] as runtime data,
    # so changing counts never retriggers a Mosaic compile.
    n_pos = meta_ref[0]
    n_neg = meta_ref[1]
    n_pos_f = n_pos.astype(jnp.float32)
    n_neg_f = n_neg.astype(jnp.float32)

    # ----- classification loss --------------------------------------------
    s = score_ref[...].astype(jnp.float32)                 # (rows, 128) dense
    neg_full = -_masked_log_sum(s, eps, size_sum)

    sel = sel_ref[...].astype(jnp.float32)                 # (1, P+NB) dense
    ps = sel[:, :pos_pad]                                   # (1, P)
    ns = sel[:, pos_pad:]                                   # (1, NB)
    pmask = lax.broadcasted_iota(jnp.int32, ps.shape, 1) < n_pos
    nmask = lax.broadcasted_iota(jnp.int32, ns.shape, 1) < n_neg
    pos_sum = -jnp.sum(jnp.where(pmask, jnp.log(ps + eps), 0.0))
    neg_sub = -jnp.sum(jnp.where(nmask, jnp.log((1.0 + eps) - ns), 0.0))

    pos_loss = pos_sum / (n_pos_f + eps)
    neg_loss = (neg_full - neg_sub) / (jnp.float32(size_sum) - n_neg_f + eps)
    cls_out_ref[0] = a * pos_loss + b * neg_loss

    # ----- regression loss (VoxelNet target encoding + SmoothL1 mean) ------
    # pos_ref is a single (21, P) operand: rows 0..6 GT, 7..13 anchors,
    # 14..20 predictions; Npos on the 128-lane axis, static row slices.
    pd = pos_ref[...].astype(jnp.float32)
    g = pd[0:7, :]
    an = pd[7:14, :]
    r = pd[14:21, :]

    d = jnp.sqrt(an[3:4, :] ** 2 + an[4:5, :] ** 2)         # (1, P)
    # Write the full (7, P) target into one scratch so the SmoothL1 pass needs
    # a single huber, a single iota mask and a single cross-lane reduction.
    t_ref[0:2, :] = (g[0:2, :] - an[0:2, :]) / d
    t_ref[2:3, :] = (g[2:3, :] - an[2:3, :]) / an[5:6, :]
    t_ref[3:6, :] = jnp.log(g[3:6, :] / an[3:6, :])
    t_ref[6:7, :] = g[6:7, :] - an[6:7, :]

    diff = r - t_ref[...]
    ad = jnp.abs(diff)
    hub = jnp.where(ad < 1.0, 0.5 * diff * diff, ad - 0.5)  # SmoothL1, beta=1
    lane = lax.broadcasted_iota(jnp.int32, hub.shape, 1)
    h_sum = jnp.sum(jnp.where(lane < n_pos, hub, 0.0))
    reg_out_ref[0] = h_sum / (jnp.maximum(n_pos_f, 1.0) * 7.0)   # 'mean'


# --------------------------------------------------------------------------
# Wrapper (JAX glue: pad + lane-major gathers; Pallas: all reductions)
# --------------------------------------------------------------------------
def voxel_loss(pi, ni, gi, gts, score, reg, anchors, anchors_per_loc,
               a=1.5, b=1.0, eps=1e-6, anchors_t=None):
    H, W, A = score.shape
    score2, size_sum, rows = _lane_dense_score(score)
    itemsize = int(score.dtype.itemsize)

    if pi is None:
        cls = pl.pallas_call(
            functools.partial(_cls_only_neg_kernel, eps=eps, size_sum=size_sum),
            grid=(1,),
            in_specs=[pl.BlockSpec((rows, _LANE), lambda i: (0, 0))],
            out_specs=pl.BlockSpec(memory_space=pltpu.MemorySpace.SMEM),
            out_shape=jax.ShapeDtypeStruct((1,), jnp.float32),
            cost_estimate=pl.CostEstimate(
                flops=6 * rows * _LANE,
                transcendentals=rows * _LANE,
                bytes_accessed=rows * _LANE * itemsize + 4),
        )(score2)
        return cls[0], None

    n_pos = int(pi[0].shape[0])
    n_neg = int(ni[0].shape[0])

    # Bucketed, lane-dense padding (multiples of 128); true counts go to SMEM.
    P = _round_up(max(n_pos, 1), _LANE)
    NB = _round_up(max(n_neg, 1), _LANE)

    flat_pi = _pad_idx((jnp.asarray(pi[0], jnp.int32) * W
                        + jnp.asarray(pi[1], jnp.int32)) * A
                       + jnp.asarray(pi[2], jnp.int32), P)
    flat_ni = _pad_idx((jnp.asarray(ni[0], jnp.int32) * W
                        + jnp.asarray(ni[1], jnp.int32)) * A
                       + jnp.asarray(ni[2], jnp.int32), NB)
    gi_p = _pad_idx(gi, P)

    # ONE combined gather for all selected scores (pos bucket, then neg bucket).
    sel = score.reshape(-1)[jnp.concatenate([flat_pi, flat_ni])]
    sel = sel.reshape(1, P + NB)

    # Per-positive tensors gathered lane-major (columns of (7, N) layouts);
    # anchors_t is static and should be precomputed once via prepare_anchors.
    if anchors_t is None:
        anchors_t = prepare_anchors(anchors, anchors_per_loc)
    gt_t = gts.T[:, gi_p]                                        # (7, P)
    an_t = anchors_t[:, flat_pi]                                 # (7, P)
    rg_t = reg.reshape(H * W * anchors_per_loc, 7)[flat_pi].T    # (7, P)
    pos_data = jnp.concatenate([gt_t, an_t, rg_t], axis=0)       # (21, P)

    meta = jnp.array([n_pos, n_neg], jnp.int32)

    cls, reg_loss = pl.pallas_call(
        functools.partial(_fused_loss_kernel, a=a, b=b, eps=eps,
                          size_sum=size_sum, pos_pad=P),
        grid_spec=pltpu.PrefetchScalarGridSpec(
            num_scalar_prefetch=1,
            grid=(1,),
            in_specs=[
                pl.BlockSpec((rows, _LANE), lambda i, m: (0, 0)),
                pl.BlockSpec((1, P + NB), lambda i, m: (0, 0)),
                pl.BlockSpec((21, P), lambda i, m: (0, 0)),
            ],
            out_specs=[
                pl.BlockSpec(memory_space=pltpu.MemorySpace.SMEM),
                pl.BlockSpec(memory_space=pltpu.MemorySpace.SMEM),
            ],
            scratch_shapes=[pltpu.VMEM((7, P), jnp.float32)],
        ),
        out_shape=[jax.ShapeDtypeStruct((1,), jnp.float32),
                   jax.ShapeDtypeStruct((1,), jnp.float32)],
        cost_estimate=pl.CostEstimate(
            flops=8 * rows * _LANE + 50 * P + 8 * NB,
            transcendentals=rows * _LANE + 5 * P + NB,
            bytes_accessed=(rows * _LANE + 22 * P + NB) * itemsize + 16),
    )(meta, score2, sel, pos_data)

    if n_pos == 0:
        return cls[0], None
    return cls[0], reg_loss[0]


# --------------------------------------------------------------------------
# Pure-JAX reference (mirrors the PyTorch forward) for a quiet self-check
# --------------------------------------------------------------------------
def _voxel_loss_ref(pi, ni, gi, gts, score, reg, anchors, apl,
                    a=1.5, b=1.0, eps=1e-6):
    if pi is None:
        return jnp.mean(-jnp.log(1.0 - score + eps)), None
    n_pos = pi[0].shape[0]
    n_neg = ni[0].shape[0]
    pos_loss = -jnp.log(score[pi[0], pi[1], pi[2]] + eps).sum()
    neg_all = -jnp.log(1.0 - score + eps)
    size_sum = score.shape[0] * score.shape[1] * score.shape[2]
    neg_loss = neg_all.sum() - neg_all[ni[0], ni[1], ni[2]].sum()
    pos_loss = pos_loss / (n_pos + eps)
    neg_loss = neg_loss / (size_sum - n_neg + eps)
    cls_loss = a * pos_loss + b * neg_loss
    if n_pos == 0:
        return cls_loss, None
    g = gts[gi]
    an = anchors.reshape(anchors.shape[0], anchors.shape[1], apl, 7)[pi[0], pi[1], pi[2]]
    r = reg.reshape(reg.shape[0], reg.shape[1], apl, 7)[pi[0], pi[1], pi[2]]
    d = jnp.sqrt(an[:, 3] ** 2 + an[:, 4] ** 2)[:, None]
    targets = jnp.concatenate([
        (g[:, 0:2] - an[:, 0:2]) / d,
        ((g[:, 2] - an[:, 2]) / an[:, 5])[:, None],
        jnp.log(g[:, 3:6] / an[:, 3:6]),
        (g[:, 6] - an[:, 6])[:, None],
    ], axis=1)
    diff = r - targets
    ad = jnp.abs(diff)
    huber = jnp.where(ad < 1.0, 0.5 * diff * diff, ad - 0.5)
    return cls_loss, huber.mean()


# --------------------------------------------------------------------------
if __name__ == "__main__":
    key = jax.random.PRNGKey(0)
    ks = jax.random.split(key, 8)

    H, W, A = 16, 16, 2      # anchor grid, anchorsPerLoc = 2
    n_gt = 5

    score = jax.random.uniform(ks[0], (H, W, A), jnp.float32, 0.01, 0.99)
    reg = 0.1 * jax.random.normal(ks[1], (H, W, A * 7), jnp.float32)

    anc_xyz = jax.random.normal(ks[2], (H, W, A, 3), jnp.float32)
    anc_size = jax.random.uniform(ks[3], (H, W, A, 3), jnp.float32, 0.5, 2.5)
    anc_yaw = jax.random.uniform(ks[4], (H, W, A, 1), jnp.float32, -1.5, 1.5)
    anchors = jnp.concatenate([anc_xyz, anc_size, anc_yaw], -1).reshape(H, W, A * 7)

    gt_xyz = jax.random.normal(ks[5], (n_gt, 3), jnp.float32)
    gt_size = jax.random.uniform(ks[6], (n_gt, 3), jnp.float32, 0.5, 2.5)
    gt_yaw = jax.random.uniform(ks[7], (n_gt, 1), jnp.float32, -1.5, 1.5)
    gts = jnp.concatenate([gt_xyz, gt_size, gt_yaw], -1)

    # positive / negative anchor indices (tuples of index arrays, as in PyTorch)
    pi = (jnp.array([0, 3, 7, 12]), jnp.array([1, 5, 9, 14]), jnp.array([0, 1, 0, 1]))
    ni = (jnp.array([2, 4, 6, 8, 10, 11]), jnp.array([0, 2, 4, 6, 8, 10]),
          jnp.array([1, 0, 1, 0, 1, 0]))
    gi = jnp.array([0, 2, 1, 4])

    # anchors are static -> hoist the lane-major transpose out of the per-call path
    anchors_t = prepare_anchors(anchors, A)

    cls_loss, reg_loss = voxel_loss(pi, ni, gi, gts, score, reg, anchors, A,
                                    anchors_t=anchors_t)
    jax.block_until_ready((cls_loss, reg_loss))

    cls_ref, reg_ref = _voxel_loss_ref(pi, ni, gi, gts, score, reg, anchors, A)
    np.testing.assert_allclose(np.asarray(cls_loss), np.asarray(cls_ref),
                               rtol=2e-3, atol=1e-5)
    np.testing.assert_allclose(np.asarray(reg_loss), np.asarray(reg_ref),
                               rtol=2e-3, atol=1e-5)

    # different counts reuse the same bucketed kernel (masking check)
    pi2 = (jnp.array([1, 2, 3]), jnp.array([0, 1, 2]), jnp.array([1, 1, 0]))
    gi2 = jnp.array([3, 1, 0])
    cls2, reg2 = voxel_loss(pi2, ni, gi2, gts, score, reg, anchors, A,
                            anchors_t=anchors_t)
    jax.block_until_ready((cls2, reg2))
    cls2_ref, reg2_ref = _voxel_loss_ref(pi2, ni, gi2, gts, score, reg, anchors, A)
    np.testing.assert_allclose(np.asarray(cls2), np.asarray(cls2_ref),
                               rtol=2e-3, atol=1e-5)
    np.testing.assert_allclose(np.asarray(reg2), np.asarray(reg2_ref),
                               rtol=2e-3, atol=1e-5)

    # also exercise the `pi is None` branch
    cls_none, reg_none = voxel_loss(None, None, None, gts, score, reg, anchors, A)
    jax.block_until_ready(cls_none)
    cls_none_ref, _ = _voxel_loss_ref(None, None, None, gts, score, reg, anchors, A)
    np.testing.assert_allclose(np.asarray(cls_none), np.asarray(cls_none_ref),
                               rtol=2e-3, atol=1e-5)
    assert reg_none is None

    print("KERNEL_OK")
</pallas_src>

<mosaic_0001>
module attributes {stable_mosaic.version = 11 : i64} {
  func.func @_fused_loss_kernel(%arg0: i32, %arg1: memref<2xi32, #tpu.memory_space<smem>>, %arg2: memref<8x128xf32, #tpu.memory_space<vmem>>, %arg3: memref<1x256xf32, #tpu.memory_space<vmem>>, %arg4: memref<21x128xf32, #tpu.memory_space<vmem>>, %arg5: memref<1xf32, #tpu.memory_space<smem>>, %arg6: memref<1xf32, #tpu.memory_space<smem>>, %arg7: memref<7x128xf32, #tpu.memory_space<vmem>>) attributes {dimension_semantics = [#tpu.dimension_semantics<arbitrary>], iteration_bounds = array<i64: 1>, scalar_prefetch = 1 : i64, scratch_operands = 1 : i64, tpu.core_type = #tpu.core_type<tc>, window_params = [{pipeline_mode = #tpu.pipeline_mode<synchronous>, transform_indices = @transform_0, window_bounds = array<i64: 8, 128>}, {pipeline_mode = #tpu.pipeline_mode<synchronous>, transform_indices = @transform_1, window_bounds = array<i64: 1, 256>}, {pipeline_mode = #tpu.pipeline_mode<synchronous>, transform_indices = @transform_2, window_bounds = array<i64: 21, 128>}, {transform_indices = @transform_3, window_bounds = array<i64: 1>}, {transform_indices = @transform_4, window_bounds = array<i64: 1>}]} {
    %c0 = arith.constant 0 : index
    %0 = memref.load %arg1[%c0] : memref<2xi32, #tpu.memory_space<smem>>
    %c1 = arith.constant 1 : index
    %1 = memref.load %arg1[%c1] : memref<2xi32, #tpu.memory_space<smem>>
    %2 = arith.sitofp %0 : i32 to f32
    %3 = arith.sitofp %1 : i32 to f32
    %c0_0 = arith.constant 0 : index
    %c0_1 = arith.constant 0 : index
    %4 = vector.load %arg2[%c0_0, %c0_1] : memref<8x128xf32, #tpu.memory_space<vmem>>, vector<8x128xf32>
    %5 = tpu.iota {dimensions = array<i32: 0>} : vector<8x128xi32>
    %6 = tpu.iota {dimensions = array<i32: 1>} : vector<8x128xi32>
    %c128_i32 = arith.constant 128 : i32
    %7 = vector.broadcast %c128_i32 : i32 to vector<8x128xi32>
    %8 = arith.muli %5, %7 : vector<8x128xi32>
    %9 = arith.addi %8, %6 : vector<8x128xi32>
    %c512_i32 = arith.constant 512 : i32
    %10 = vector.broadcast %c512_i32 : i32 to vector<8x128xi32>
    %11 = arith.cmpi slt, %9, %10 : vector<8x128xi32>
    %cst = arith.constant 1.00000095 : f32
    %12 = vector.broadcast %cst : f32 to vector<8x128xf32>
    %13 = arith.subf %12, %4 : vector<8x128xf32>
    %14 = math.log %13 : vector<8x128xf32>
    %cst_2 = arith.constant 0.000000e+00 : f32
    %15 = vector.broadcast %cst_2 : f32 to vector<8x128xf32>
    %16 = arith.select %11, %14, %15 : vector<8x128xi1>, vector<8x128xf32>
    %17 = vector.shape_cast %16 : vector<8x128xf32> to vector<1x8x128xf32>
    %cst_3 = arith.constant dense<0.000000e+00> : vector<1xf32>
    %18 = vector.multi_reduction <add>, %17, %cst_3 [1, 2] : vector<1x8x128xf32> to vector<1xf32>
    %19 = vector.shape_cast %18 : vector<1xf32> to vector<1x1x1xf32>
    %20 = vector.extract %19[0, 0, 0] : f32 from vector<1x1x1xf32>
    %cst_4 = arith.constant 0.000000e+00 : f32
    %21 = arith.subf %cst_4, %20 : f32
    %c0_5 = arith.constant 0 : index
    %c0_6 = arith.constant 0 : index
    %22 = vector.load %arg3[%c0_5, %c0_6] : memref<1x256xf32, #tpu.memory_space<vmem>>, vector<1x256xf32>
    %23 = vector.extract_strided_slice %22 {offsets = [0, 0], sizes = [1, 128], strides = [1, 1]} : vector<1x256xf32> to vector<1x128xf32>
    %24 = vector.extract_strided_slice %22 {offsets = [0, 128], sizes = [1, 128], strides = [1, 1]} : vector<1x256xf32> to vector<1x128xf32>
    %25 = tpu.iota {dimensions = array<i32: 1>} : vector<1x128xi32>
    %26 = vector.broadcast %0 : i32 to vector<1x128xi32>
    %27 = arith.cmpi slt, %25, %26 : vector<1x128xi32>
    %28 = tpu.iota {dimensions = array<i32: 1>} : vector<1x128xi32>
    %29 = vector.broadcast %1 : i32 to vector<1x128xi32>
    %30 = arith.cmpi slt, %28, %29 : vector<1x128xi32>
    %cst_7 = arith.constant 9.99999997E-7 : f32
    %31 = vector.broadcast %cst_7 : f32 to vector<1x128xf32>
    %32 = arith.addf %23, %31 : vector<1x128xf32>
    %33 = math.log %32 : vector<1x128xf32>
    %cst_8 = arith.constant 0.000000e+00 : f32
    %34 = vector.broadcast %cst_8 : f32 to vector<1x128xf32>
    %35 = arith.select %27, %33, %34 : vector<1x128xi1>, vector<1x128xf32>
    %36 = vector.shape_cast %35 : vector<1x128xf32> to vector<1x1x128xf32>
    %cst_9 = arith.constant dense<0.000000e+00> : vector<1xf32>
    %37 = vector.multi_reduction <add>, %36, %cst_9 [1, 2] : vector<1x1x128xf32> to vector<1xf32>
    %38 = vector.shape_cast %37 : vector<1xf32> to vector<1x1x1xf32>
    %39 = vector.extract %38[0, 0, 0] : f32 from vector<1x1x1xf32>
    %cst_10 = arith.constant 0.000000e+00 : f32
    %40 = arith.subf %cst_10, %39 : f32
    %cst_11 = arith.constant 1.00000095 : f32
    %41 = vector.broadcast %cst_11 : f32 to vector<1x128xf32>
    %42 = arith.subf %41, %24 : vector<1x128xf32>
    %43 = math.log %42 : vector<1x128xf32>
    %cst_12 = arith.constant 0.000000e+00 : f32
    %44 = vector.broadcast %cst_12 : f32 to vector<1x128xf32>
    %45 = arith.select %30, %43, %44 : vector<1x128xi1>, vector<1x128xf32>
    %46 = vector.shape_cast %45 : vector<1x128xf32> to vector<1x1x128xf32>
    %cst_13 = arith.constant dense<0.000000e+00> : vector<1xf32>
    %47 = vector.multi_reduction <add>, %46, %cst_13 [1, 2] : vector<1x1x128xf32> to vector<1xf32>
    %48 = vector.shape_cast %47 : vector<1xf32> to vector<1x1x1xf32>
    %49 = vector.extract %48[0, 0, 0] : f32 from vector<1x1x1xf32>
    %cst_14 = arith.constant 0.000000e+00 : f32
    %50 = arith.subf %cst_14, %49 : f32
    %cst_15 = arith.constant 9.99999997E-7 : f32
    %51 = arith.addf %2, %cst_15 : f32
    %52 = arith.divf %40, %51 : f32
    %53 = arith.subf %21, %50 : f32
    %cst_16 = arith.constant 5.120000e+02 : f32
    %54 = arith.subf %cst_16, %3 : f32
    %cst_17 = arith.constant 9.99999997E-7 : f32
    %55 = arith.addf %54, %cst_17 : f32
    %56 = arith.divf %53, %55 : f32
    %cst_18 = arith.constant 1.500000e+00 : f32
    %57 = arith.mulf %cst_18, %52 : f32
    %cst_19 = arith.constant 1.000000e+00 : f32
    %58 = arith.mulf %cst_19, %56 : f32
    %59 = arith.addf %57, %58 : f32
    %c0_20 = arith.constant 0 : index
    %60 = memref.load %arg5[%c0_20] : memref<1xf32, #tpu.memory_space<smem>>
    memref.store %59, %arg5[%c0_20] : memref<1xf32, #tpu.memory_space<smem>>
    %c0_21 = arith.constant 0 : index
    %c0_22 = arith.constant 0 : index
    %61 = vector.load %arg4[%c0_21, %c0_22] : memref<21x128xf32, #tpu.memory_space<vmem>>, vector<21x128xf32>
    %62 = vector.extract_strided_slice %61 {offsets = [0, 0], sizes = [7, 128], strides = [1, 1]} : vector<21x128xf32> to vector<7x128xf32>
    %63 = vector.extract_strided_slice %61 {offsets = [7, 0], sizes = [7, 128], strides = [1, 1]} : vector<21x128xf32> to vector<7x128xf32>
    %64 = vector.extract_strided_slice %61 {offsets = [14, 0], sizes = [7, 128], strides = [1, 1]} : vector<21x128xf32> to vector<7x128xf32>
    %65 = vector.extract_strided_slice %63 {offsets = [3, 0], sizes = [1, 128], strides = [1, 1]} : vector<7x128xf32> to vector<1x128xf32>
    %66 = arith.mulf %65, %65 : vector<1x128xf32>
    %67 = vector.extract_strided_slice %63 {offsets = [4, 0], sizes = [1, 128], strides = [1, 1]} : vector<7x128xf32> to vector<1x128xf32>
    %68 = arith.mulf %67, %67 : vector<1x128xf32>
    %69 = arith.addf %66, %68 : vector<1x128xf32>
    %70 = math.sqrt %69 : vector<1x128xf32>
    %71 = vector.extract_strided_slice %62 {offsets = [0, 0], sizes = [2, 128], strides = [1, 1]} : vector<7x128xf32> to vector<2x128xf32>
    %72 = vector.extract_strided_slice %63 {offsets = [0, 0], sizes = [2, 128], strides = [1, 1]} : vector<7x128xf32> to vector<2x128xf32>
    %73 = arith.subf %71, %72 : vector<2x128xf32>
    %74 = vector.broadcast %70 : vector<1x128xf32> to vector<2x128xf32>
    %75 = arith.divf %73, %74 : vector<2x128xf32>
    %c0_23 = arith.constant 0 : index
    %c0_24 = arith.constant 0 : index
    %76 = vector.load %arg7[%c0_23, %c0_24] : memref<7x128xf32, #tpu.memory_space<vmem>>, vector<2x128xf32>
    tpu.vector_store %arg7[%c0_23, %c0_24], %75 {strides = array<i32>} : memref<7x128xf32, #tpu.memory_space<vmem>>, vector<2x128xf32>,
    %77 = vector.extract_strided_slice %62 {offsets = [2, 0], sizes = [1, 128], strides = [1, 1]} : vector<7x128xf32> to vector<1x128xf32>
    %78 = vector.extract_strided_slice %63 {offsets = [2, 0], sizes = [1, 128], strides = [1, 1]} : vector<7x128xf32> to vector<1x128xf32>
    %79 = arith.subf %77, %78 : vector<1x128xf32>
    %80 = vector.extract_strided_slice %63 {offsets = [5, 0], sizes = [1, 128], strides = [1, 1]} : vector<7x128xf32> to vector<1x128xf32>
    %81 = arith.divf %79, %80 : vector<1x128xf32>
    %c2 = arith.constant 2 : index
    %c0_25 = arith.constant 0 : index
    %82 = vector.load %arg7[%c2, %c0_25] : memref<7x128xf32, #tpu.memory_space<vmem>>, vector<1x128xf32>
    tpu.vector_store %arg7[%c2, %c0_25], %81 {strides = array<i32>} : memref<7x128xf32, #tpu.memory_space<vmem>>, vector<1x128xf32>,
    %83 = vector.extract_strided_slice %62 {offsets = [3, 0], sizes = [3, 128], strides = [1, 1]} : vector<7x128xf32> to vector<3x128xf32>
    %84 = vector.extract_strided_slice %63 {offsets = [3, 0], sizes = [3, 128], strides = [1, 1]} : vector<7x128xf32> to vector<3x128xf32>
    %85 = arith.divf %83, %84 : vector<3x128xf32>
    %86 = math.log %85 : vector<3x128xf32>
    %c3 = arith.constant 3 : index
    %c0_26 = arith.constant 0 : index
    %87 = vector.load %arg7[%c3, %c0_26] : memref<7x128xf32, #tpu.memory_space<vmem>>, vector<3x128xf32>
    tpu.vector_store %arg7[%c3, %c0_26], %86 {strides = array<i32>} : memref<7x128xf32, #tpu.memory_space<vmem>>, vector<3x128xf32>,
    %88 = vector.extract_strided_slice %62 {offsets = [6, 0], sizes = [1, 128], strides = [1, 1]} : vector<7x128xf32> to vector<1x128xf32>
    %89 = vector.extract_strided_slice %63 {offsets = [6, 0], sizes = [1, 128], strides = [1, 1]} : vector<7x128xf32> to vector<1x128xf32>
    %90 = arith.subf %88, %89 : vector<1x128xf32>
    %c6 = arith.constant 6 : index
    %c0_27 = arith.constant 0 : index
    %91 = vector.load %arg7[%c6, %c0_27] : memref<7x128xf32, #tpu.memory_space<vmem>>, vector<1x128xf32>
    tpu.vector_store %arg7[%c6, %c0_27], %90 {strides = array<i32>} : memref<7x128xf32, #tpu.memory_space<vmem>>, vector<1x128xf32>,
    %c0_28 = arith.constant 0 : index
    %c0_29 = arith.constant 0 : index
    %92 = vector.load %arg7[%c0_28, %c0_29] : memref<7x128xf32, #tpu.memory_space<vmem>>, vector<7x128xf32>
    %93 = arith.subf %64, %92 : vector<7x128xf32>
    %94 = math.absf %93 : vector<7x128xf32>
    %cst_30 = arith.constant 1.000000e+00 : f32
    %95 = vector.broadcast %cst_30 : f32 to vector<7x128xf32>
    %96 = arith.cmpf olt, %94, %95 : vector<7x128xf32>
    %cst_31 = arith.constant 5.000000e-01 : f32
    %97 = vector.broadcast %cst_31 : f32 to vector<7x128xf32>
    %98 = arith.mulf %97, %93 : vector<7x128xf32>
    %99 = arith.mulf %98, %93 : vector<7x128xf32>
    %cst_32 = arith.constant 5.000000e-01 : f32
    %100 = vector.broadcast %cst_32 : f32 to vector<7x128xf32>
    %101 = arith.subf %94, %100 : vector<7x128xf32>
    %102 = arith.select %96, %99, %101 : vector<7x128xi1>, vector<7x128xf32>
    %103 = tpu.iota {dimensions = array<i32: 1>} : vector<7x128xi32>
    %104 = vector.broadcast %0 : i32 to vector<7x128xi32>
    %105 = arith.cmpi slt, %103, %104 : vector<7x128xi32>
    %cst_33 = arith.constant 0.000000e+00 : f32
    %106 = vector.broadcast %cst_33 : f32 to vector<7x128xf32>
    %107 = arith.select %105, %102, %106 : vector<7x128xi1>, vector<7x128xf32>
    %108 = vector.shape_cast %107 : vector<7x128xf32> to vector<1x7x128xf32>
    %cst_34 = arith.constant dense<0.000000e+00> : vector<1xf32>
    %109 = vector.multi_reduction <add>, %108, %cst_34 [1, 2] : vector<1x7x128xf32> to vector<1xf32>
    %110 = vector.shape_cast %109 : vector<1xf32> to vector<1x1x1xf32>
    %111 = vector.extract %110[0, 0, 0] : f32 from vector<1x1x1xf32>
    %cst_35 = arith.constant 1.000000e+00 : f32
    %112 = arith.maximumf %2, %cst_35 : f32
    %cst_36 = arith.constant 7.000000e+00 : f32
    %113 = arith.mulf %112, %cst_36 : f32
    %114 = arith.divf %111, %113 : f32
    %c0_37 = arith.constant 0 : index
    %115 = memref.load %arg6[%c0_37] : memref<1xf32, #tpu.memory_space<smem>>
    memref.store %114, %arg6[%c0_37] : memref<1xf32, #tpu.memory_space<smem>>
    return
  }
  func.func @transform_0(%arg0: i32, %arg1: memref<2xi32, #tpu.memory_space<smem>>) -> (i32, i32) {
    %c0_i32 = arith.constant 0 : i32
    %c0_i32_0 = arith.constant 0 : i32
    %c0_i32_1 = arith.constant 0 : i32
    return %c0_i32, %c0_i32_0 : i32, i32
  }
  func.func @transform_1(%arg0: i32, %arg1: memref<2xi32, #tpu.memory_space<smem>>) -> (i32, i32) {
    %c0_i32 = arith.constant 0 : i32
    %c0_i32_0 = arith.constant 0 : i32
    %c0_i32_1 = arith.constant 0 : i32
    return %c0_i32, %c0_i32_0 : i32, i32
  }
  func.func @transform_2(%arg0: i32, %arg1: memref<2xi32, #tpu.memory_space<smem>>) -> (i32, i32) {
    %c0_i32 = arith.constant 0 : i32
    %c0_i32_0 = arith.constant 0 : i32
    %c0_i32_1 = arith.constant 0 : i32
    return %c0_i32, %c0_i32_0 : i32, i32
  }
  func.func @transform_3(%arg0: i32, %arg1: memref<2xi32, #tpu.memory_space<smem>>) -> i32 {
    %c0_i32 = arith.constant 0 : i32
    %c0_i32_0 = arith.constant 0 : i32
    return %c0_i32 : i32
  }
  func.func @transform_4(%arg0: i32, %arg1: memref<2xi32, #tpu.memory_space<smem>>) -> i32 {
    %c0_i32 = arith.constant 0 : i32
    %c0_i32_0 = arith.constant 0 : i32
    return %c0_i32 : i32
  }
}

</mosaic_0001>

<bundles_post_ra>
// kernel: tpu_custom_call.1
= control target key start
LH: loop header
LB: loop body
LE: loop exit
PB: predicated region body
PF: predicated region fallthrough
CT: control target
= control target key end

     0   :  { %s519_s0 = inlined_call_operand.hbm [shape: s32[2], index: 0, kind: input, shape index: {}]   ;;  %s520_s1 = inlined_call_operand.hbm [shape: f32[8,128], index: 1, kind: input, shape index: {}]   ;;  %s521_s2 = inlined_call_operand.vmem [shape: f32[1,256], index: 2, kind: input, shape index: {}]   ;;  %s522_s3 = inlined_call_operand.hbm [shape: f32[21,128], index: 3, kind: input, shape index: {}]   ;;  %s523_s4 = inlined_call_operand.hbm [shape: f32[1], index: 4, kind: output, shape index: {0}]   ;;  %s524_s5 = inlined_call_operand.hbm [shape: f32[1], index: 5, kind: output, shape index: {1}]  }
   0x1   :  { %s292_s20 = scalar_lea.hbm %s519_s0, 16 }
   0x2   :  { %p293_p0 = scmp.ne.s32.totalorder %s519_s0, %s292_s20  ;;  %p296_p1 = scmp.lt.u32.totalorder %s292_s20, %s519_s0 }
   0x4   :  { %p298_p2 = pnand %p296_p1, %p293_p0 }
   0x6   :  { %301 = shalt.err (!%p298_p2)  }
   0x7   :  { %s376_s25 = smov [#allocation4]  }
   0x8   :  { %12 = dma.hbm_to_smem %s519_s0, 16, %s376_s25, [#allocation3] }
   0x9   :  { %366 = dma.done.wait [#allocation3], 16 }
   0xa   :  { %367 = vsyncadd [#allocation3], 4294967280 }
   0xb   :  { %14 = sfence }
   0xc   :  { %15 = vsyncpa [#allocation6], 0 }
   0xd   :  { %16 = vsyncpa [#allocation9], 0 }
   0xe   :  { %17 = vsyncpa [#allocation7], 0 }
   0xf   :  { %18 = vsyncpa [#allocation12], 0  ;;  %s377_s28 = smov [#allocation5]   ;;  %s378_s30 = smov [#allocation8]  }
  0x10   :  { %s25_s29 = sshll.u32 %s377_s28, 4  ;;  %s36_s6 = sshll.u32 %s378_s30, 4  ;;  %s26_s29 = int_to_ptr.vmem [resolvable:$true] %s25_s29  ;;  %s426_s6 = int_to_ptr.vmem [resolvable:$true] %s36_s6 }
  0x11   :  { %s302_s9 = scalar_lea.hbm %s520_s1, 128 }
  0x12   :  { %p303_p3 = scmp.ne.s32.totalorder %s520_s1, %s302_s9  ;;  %p306_p4 = scmp.lt.u32.totalorder %s302_s9, %s520_s1 }
  0x14   :  { %p308_p5 = pnand %p306_p4, %p303_p3 }
  0x16   :  { %311 = shalt.err (!%p308_p5)
}
  0x17   :  { %s312_s13 = scalar_lea.vmem %s26_s29, 128  ;;  %p317_p7 = scmp.lt.s32.totalorder %s26_s29, %s26_s29 }
  0x18   :  { %p313_p6 = scmp.ne.s32.totalorder %s26_s29, %s312_s13  ;;  %p318_p8 = scmp.lt.s32.totalorder %s312_s13, %s312_s13 }
  0x1a   :  { %p319_p9 = por %p318_p8, %p317_p7 }
  0x1c   :  { %p320_p10 = pnand %p319_p9, %p313_p6 }
  0x1e   :  { %323 = shalt.err (!%p320_p10)
}
  0x1f   :  { %28 = dma.hbm_to_vmem [thread:$0]  %s520_s1, 128, %s26_s29, [#allocation6]  }
  0x20   :  { %s324_s18 = scalar_lea.hbm %s522_s3, 384 }
  0x21   :  { %p325_p11 = scmp.ne.s32.totalorder %s522_s3, %s324_s18  ;;  %p328_p12 = scmp.lt.u32.totalorder %s324_s18, %s522_s3 }
  0x23   :  { %p330_p13 = pnand %p328_p12, %p325_p11 }
  0x25   :  { %333 = shalt.err (!%p330_p13)
}
  0x26   :  { %s334_s23 = scalar_lea.vmem %s426_s6, 384  ;;  %p339_p1 = scmp.lt.s32.totalorder %s426_s6, %s426_s6 }
  0x27   :  { %p335_p0 = scmp.ne.s32.totalorder %s426_s6, %s334_s23  ;;  %p340_p2 = scmp.lt.s32.totalorder %s334_s23, %s334_s23 }
  0x29   :  { %p341_p3 = por %p340_p2, %p339_p1 }
  0x2b   :  { %p342_p4 = pnand %p341_p3, %p335_p0 }
  0x2d   :  { %345 = shalt.err (!%p342_p4)
}
  0x2e   :  { %s379_s1 = smov 128   ;;  %s380_s24 = smov 8  }
  0x2f   :  { %42 = dma.hbm_to_vmem [thread:$0]  %s522_s3, 384, %s426_s6, [#allocation9], %s379_s1, %s379_s1, %s380_s24  }
  0x30   :  { %368 = dma.done.wait [#allocation6], 128  }
  0x31   :  { %369 = vsyncadd [#allocation6], 4294967168 }
  0x32   :  { %370 = dma.done.wait [#allocation9], 384  }
  0x33   :  { %371 = vsyncadd [#allocation9], 4294966912  ;;  %v54_v0 = vlaneseq  ;;  %v53_v1 = vld [vmem:[#allocation5] sm:$0xff]  ;;  %v457_v2 = vld [vmem:[#allocation8 + $0x8] sm:$0xff]  ;;  %s468_s3 = sld [smem:[#allocation4]]  ;;  %vm84_vm5 = vcmask 1040384  }
  0x34   :  { %v75_v3 = vld [vmem:[%s521_s2] sm:$0x3]  ;;  %v61_v4 = vsub.f32 1.000001, %v53_v1  ;;  %v133_v5 = vmul.f32 %v457_v2, %v457_v2  ;;  %v148_v7 = vrot.slane %v457_v2, 7  ;;  %v161_v8 = vrot.slane %v457_v2, 2 }
  0x35   :  { %v97_v6 = vrot.slane %v75_v3, 1  ;;  %v55_v9 = vshrl.u32 %v54_v0, 7  ;;  %v130_v11 = vld [vmem:[#allocation8] sm:$0xff]  ;;  %v80_v14 = vadd.f32 1e-06, %v75_v3  ;;  %v57_v15 = vand.u32 127, %v54_v0 }
  0x36   :  { %270 = vlog2.f32 %v61_v4  ;;  %v135_v10 = vrot.slane %v133_v5, 1  ;;  %v160_v13 = vsub.f32 %v130_v11, %v148_v7  ;;  %s466_s2 = sld [smem:[#allocation4 + $0x1]]  ;;  %v147_v45 = vrot.slane %v130_v11, 7  ;;  %v132_v52 = vld [vmem:[#allocation8 + $0x10] sm:$0x1f]  ;;  %s381_s9 = smov 1.0  }
  0x37   :  { %v99_v12 = vsub.f32 1.000001, %v97_v6  ;;  %272 = vrcp.f32 %v161_v8  ;;  %v58_v16 = vmul.u32 128, %v55_v9  ;;  %v154_v32 = vsub.s32 2, %v55_v9  ;;  %s346_s25 = scalar_lea.hbm %s523_s4, 16 }
  0x38   :  { %v137_v17 = vadd.f32 %v135_v10, %v133_v5  ;;  %274 = vrcp.f32 %v148_v7  ;;  %171 = vst [vmem:[#allocation2] sm:$0x40] %v160_v13  ;;  %v149_v47 = vsel %vm84_vm5, %v147_v45, %v148_v7  ;;  %vm194_vm8 = vcmask 1041408   ;;  %p347_p5 = scmp.ne.s32.totalorder %s523_s4, %s346_s25  ;;  %p350_p6 = scmp.lt.u32.totalorder %s346_s25, %s523_s4 }
  0x39   :  { %276 = vlog2.f32 %v99_v12  ;;  %v59_v18 = vadd.s32 %v58_v16, %v57_v15  ;;  %v76_v25 = vstv %s468_s3  ;;  %v151_v49 = vsub.f32 %v130_v11, %v149_v47  ;;  %s51_s30 = scvt.s32.f32 %s468_s3 }
  0x3a   :  { %278 = vrsqrt.f32 %v137_v17  ;;  %vm140_vm2 = vcmp.eq.f32.partialorder %v137_v17, inf  ;;  %v143_v31 = vand.u32 2147483648, %v137_v17  ;;  %vm142_vm3 = vcmp.eq.f32.partialorder %v137_v17, 0.0  ;;  %p352_p7 = pnand %p350_p6, %p347_p5 }
  0x3b   :  { %280 = vlog2.f32 %v80_v14  ;;  %vm60_vm0 = vcmp.lt.s32.totalorder %v59_v18, 512  ;;  %vm476_vm4 = vcmp.lt.s32.totalorder %v57_v15, %v76_v25  ;;  %vm199_vm9 = vcmask 1046528   ;;  %s114_s7 = sadd.f32 1e-06, %s51_s30  ;;  %s210_s10 = smax.f32 %s381_s9, %s51_s30 }
  0x3c   :  { %v78_v20 = vstv %s466_s2  ;;  %s52_s29 = scvt.s32.f32 %s466_s2  ;;  %s211_s0 = smul.f32 7.0, %s210_s10 }
  0x3d   :  { %vm472_vm1 = vcmp.lt.s32.totalorder %v57_v15, %v78_v20  ;;  %v115_v15 = vstv %s114_s7 }
  0x3e   :  { %s120_s6 = ssub.f32 512.0, %s52_s29 }
  0x40   :  { %v271_v19 = vpop.eup %270  ;;  %s121_s8 = sadd.f32 1e-06, %s120_s6 }
  0x41   :  { %v273_v21 = vpop.eup %272  ;;  %v63_v22 = vmul.f32 0.6931472, %v271_v19 }
  0x42   :  { %v275_v23 = vpop.eup %274  ;;  %v164_v24 = vmul.f32 %v273_v21, %v160_v13 }
  0x43   :  { %v277_v26 = vpop.eup %276  ;;  %v64_v27 = vsel %vm60_vm0, %v63_v22, 0.0  ;;  %v167_v29 = vmul.f32 %v275_v23, %v130_v11 }
  0x44   :  { %v279_v30 = vpop.eup %278  ;;  %65 = vadd.xlane.f32.xlu0 %v64_v27  ;;  %v101_v33 = vmul.f32 0.6931472, %v277_v26  ;;  %165 = vst [vmem:[#allocation2] sm:$0x4] %v164_v24 }
  0x45   :  { %v281_v34 = vpop.eup %280  ;;  %v139_v35 = vmul.f32 %v279_v30, %v137_v17  ;;  %282 = vlog2.f32 %v167_v29 }
  0x46   :  { %v102_v37 = vsel %vm472_vm1, %v101_v33, 0.0  ;;  %v82_v38 = vmul.f32 0.6931472, %v281_v34  ;;  %v212_v34 = vstv %s211_s0 }
  0x47   :  { %v141_v39 = vsel %vm140_vm2, %v137_v17, %v139_v35  ;;  %v103_v40 = vsel %vm84_vm5, %v102_v37, 0.0  ;;  %v122_v17 = vstv %s121_s8 }
  0x48   :  { %v144_v41 = vsel %vm142_vm3, %v143_v31, %v141_v39  ;;  %104 = vadd.xlane.f32.xlu1 %v103_v40  ;;  %v83_v42 = vsel %vm476_vm4, %v82_v38, 0.0 }
  0x49   :  { %v155_v43 = vrot.slane %v144_v41, %v154_v32  ;;  %v85_v44 = vsel %vm84_vm5, %v83_v42, 0.0 }
  0x4a   :  { %86 = vadd.xlane.f32.xlu0 %v85_v44 }
  0x4b   :  { %284 = vrcp.f32 %v155_v43 }
  0x4c   :  { %286 = vrcp.f32 %v115_v15 }
  0x4d   :  { %288 = vrcp.f32 %v122_v17 }
  0x4e   :  { %290 = vrcp.f32 %v212_v34 }
  0x4f   :  { %v283_v46 = vpop.eup %282 }
  0x50   :  { %v169_v48 = vmul.f32 0.6931472, %v283_v46 }
  0x52   :  { %170 = vst [vmem:[#allocation2] sm:$0x38] %v169_v48 }
  0x55   :  { %v285_v50 = vpop.eup %284 }
  0x56   :  { %v157_v51 = vmul.f32 %v285_v50, %v151_v49  ;;  %v287_v32 = vpop.eup %286 }
  0x57   :  { %v289_v33 = vpop.eup %288 }
  0x58   :  { %158 = vst [vmem:[#allocation2] sm:$0x3] %v157_v51  ;;  %v291_v41 = vpop.eup %290 }
  0x5f   :  { %v172_v53 = vld [vmem:[#allocation2] sm:$0x7f] }
  0x60   :  { %v174_v54 = vrot.slane %v172_v53, 2 }
  0x62   :  { %v176_v55 = vsub.f32 %v457_v2, %v174_v54  ;;  %v177_v56 = vsub.f32 %v132_v52, %v174_v54 }
  0x64   :  { %v178_v57 = vand.u32 2147483647, %v176_v55  ;;  %v179_v58 = vand.u32 2147483647, %v177_v56  ;;  %v182_v59 = vmul.f32 0.5, %v176_v55  ;;  %v183_v60 = vmul.f32 0.5, %v177_v56 }
  0x66   :  { %vm180_vm6 = vcmp.lt.f32.partialorder %v178_v57, 1.0  ;;  %vm181_vm7 = vcmp.lt.f32.partialorder %v179_v58, 1.0  ;;  %v184_v61 = vmul.f32 %v182_v59, %v176_v55  ;;  %v185_v62 = vmul.f32 %v183_v60, %v177_v56 }
  0x67   :  { %v246_v63 = vadd.f32 -0.5, %v178_v57  ;;  %v247_v0 = vadd.f32 -0.5, %v179_v58 }
  0x69   :  { %v188_v1 = vsel %vm180_vm6, %v184_v61, %v246_v63  ;;  %v189_v3 = vsel %vm181_vm7, %v185_v62, %v247_v0 }
  0x6a   :  { %v190_v4 = vsel %vm476_vm4, %v188_v1, 0.0  ;;  %v191_v2 = vsel %vm476_vm4, %v189_v3, 0.0 }
  0x6b   :  { %v195_v5 = vrot.slane %v190_v4, 6  ;;  %v196_v6 = vrot.slane %v191_v2, 6 }
  0x6d   :  { %v197_v7 = vsel %vm194_vm8, %v195_v5, %v196_v6 }
  0x6e   :  { %v200_v8 = vsel %vm199_vm9, %v197_v7, 0.0 }
  0x6f   :  { %201 = vadd.xlane.f32.xlu1 %v200_v8 }
  0xd1   :  { %v66_v9 = vpop.xlane.xlu0 %65 }
  0xd2   :  { %v67_v10 = vrot.slane %v66_v9, 4 }
  0xd4   :  { %v68_v11 = vadd.f32 %v67_v10, %v66_v9 }
  0xd5   :  { %v105_v12 = vpop.xlane.xlu1 %104 }
  0xd6   :  { %v69_v13 = vrot.slane %v68_v11, 2  ;;  %v106_v14 = vrot.slane %v105_v12, 4 }
  0xd7   :  { %v87_v16 = vpop.xlane.xlu0 %86 }
  0xd8   :  { %v107_v18 = vadd.f32 %v106_v14, %v105_v12  ;;  %v88_v19 = vrot.slane %v87_v16, 4  ;;  %v70_v20 = vadd.f32 %v69_v13, %v68_v11 }
  0xda   :  { %v108_v21 = vrot.slane %v107_v18, 2  ;;  %v89_v22 = vadd.f32 %v88_v19, %v87_v16  ;;  %v71_v23 = vrot.slane %v70_v20, 1 }
  0xdc   :  { %v90_v24 = vrot.slane %v89_v22, 2  ;;  %v72_v25 = vadd.f32 %v71_v23, %v70_v20  ;;  %v109_v26 = vadd.f32 %v108_v21, %v107_v18 }
  0xde   :  { %v91_v27 = vadd.f32 %v90_v24, %v89_v22  ;;  %248 = vpush %v72_v25  ;;  %v110_v28 = vrot.slane %v109_v26, 1 }
  0xe0   :  { %v92_v29 = vrot.slane %v91_v27, 1  ;;  %v111_v30 = vadd.f32 %v110_v28, %v109_v26 }
  0xe2   :  { %v93_v31 = vadd.f32 %v92_v29, %v91_v27 }
  0xe4   :  { %250 = vpush %v93_v31 }
  0xe5   :  { %252 = vpush %v111_v30 }
  0xe6   :  { %254 = vpush %v287_v32 }
  0xe7   :  { %256 = vpush %v289_v33 }
  0xfc   :  { %v202_v35 = vpop.xlane.xlu1 %201 }
  0xfd   :  { %v203_v36 = vrot.slane %v202_v35, 4 }
  0xff   :  { %v204_v37 = vadd.f32 %v203_v36, %v202_v35 }
 0x101   :  { %v205_v38 = vrot.slane %v204_v37, 2 }
 0x103   :  { %v206_v39 = vadd.f32 %v205_v38, %v204_v37 }
 0x105   :  { %v207_v40 = vrot.slane %v206_v39, 1 }
 0x107   :  { %v208_v42 = vadd.f32 %v207_v40, %v206_v39 }
 0x109   :  { %258 = vpush %v208_v42 }
 0x10a   :  { %260 = vpush %v291_v41 }
 0x10f   :  { %s249_s11 = spop %248 }
 0x110   :  { %s74_s12 = ssub.f32 0.0, %s249_s11 }
 0x115   :  { %s251_s13 = spop %250 }
 0x116   :  { %s95_s14 = ssub.f32 0.0, %s251_s13  ;;  %s253_s15 = spop %252 }
 0x117   :  { %s113_s16 = ssub.f32 0.0, %s253_s15  ;;  %s255_s17 = spop %254 }
 0x118   :  { %s118_s18 = smul.f32 %s255_s17, %s95_s14  ;;  %s257_s19 = spop %256 }
 0x119   :  { %s119_s20 = ssub.f32 %s74_s12, %s113_s16 }
 0x11a   :  { %s126_s21 = smul.f32 1.5, %s118_s18 }
 0x11b   :  { %s125_s22 = smul.f32 %s257_s19, %s119_s20 }
 0x11d   :  { %s127_s23 = sadd.f32 %s126_s21, %s125_s22 }
 0x11f   :  { %129 = sst [smem:[#allocation10]] %s127_s23 }
 0x120   :  { %355 = shalt.err (!%p352_p7)
}
 0x121   :  { %s382_s3 = smov [#allocation10]   ;;  %s356_s0 = scalar_lea.hbm %s524_s5, 16 }
 0x122   :  { %225 = dma.smem_to_hbm %s382_s3, 16, %s523_s4, [#allocation7]  }
 0x123   :  { %p357_p8 = scmp.ne.s32.totalorder %s524_s5, %s356_s0  ;;  %p360_p9 = scmp.lt.u32.totalorder %s356_s0, %s524_s5 }
 0x125   :  { %p362_p10 = pnand %p360_p9, %p357_p8 }
 0x13a   :  { %s259_s6 = spop %258 }
 0x13b   :  { %s261_s7 = spop %260 }
 0x13c   :  { %s215_s8 = smul.f32 %s261_s7, %s259_s6 }
 0x13e   :  { %217 = sst [smem:[#allocation11]] %s215_s8 }
 0x13f   :  { %365 = shalt.err (!%p362_p10)
}
 0x140   :  { %s383_s15 = smov [#allocation11]  }
 0x141   :  { %233 = dma.smem_to_hbm %s383_s15, 16, %s524_s5, [#allocation12]  }
 0x142   :  { %372 = dma.done.wait [#allocation7], 16  }
 0x143   :  { %373 = vsyncadd [#allocation7], 4294967280 }
 0x144   :  { %374 = dma.done.wait [#allocation12], 16  }
 0x145   :  { %375 = vsyncadd [#allocation12], 4294967280 }
 0x146   :  { %240 = sfence }
 0x147   :  { %241 = vsyncpa [#allocation6], 1 }
 0x148   :  { %242 = vsyncpa [#allocation9], 1 }
 0x149   :  { %243 = vsyncpa [#allocation7], 1 }
 0x14a   :  { %244 = vsyncpa [#allocation12], 1 }

</bundles_post_ra>
